<compile_context>
chip_gen: v6e
topology: v6e:2x2x1
jax: 0.10.0
libtpu: 0.0.40
codegen_flags: <defaults>
</compile_context>

<pallas_src>
import numpy as np
import jax
import jax.numpy as jnp
from jax.experimental import pallas as pl
from jax.experimental.pallas import tpu as pltpu


def _bilinear_matrix(n_in, n_out):
    """Interpolation matrix (n_out, n_in) matching Upsample(bilinear, align_corners=True)."""
    A = np.zeros((n_out, n_in), dtype=np.float64)
    if n_in == 1 or n_out == 1:
        A[:, 0] = 1.0
        return A
    for i in range(n_out):
        src = i * (n_in - 1) / (n_out - 1)
        i0 = int(np.floor(src))
        i1 = min(i0 + 1, n_in - 1)
        w1 = src - i0
        A[i, i0] += 1.0 - w1
        A[i, i1] += w1
    return A


# ----------------------------------------------------------------------------- kernel
def upblock_kernel(x_ref, ah_ref, cw_ref, s1_ref, b1_ref, w2k_ref, s2_ref, b2_ref,
                   o_ref):
    cdt = ah_ref.dtype                       # MXU operand dtype (bf16 perf / f32 check)
    NB = x_ref.shape[0]
    H2 = o_ref.shape[1]

    # Per-image row interpolation for all three vertical taps (AH stacked: (3*H2, H)).
    # Result is requested directly in the compute dtype (no extra casts later).
    r_list = [jnp.dot(ah_ref[...], x_ref[i].astype(cdt), preferred_element_type=cdt)
              for i in range(NB)]

    # Per vertical tap: stack the NB per-image tiles along sublanes -> M = NB*H2, then
    # one lane-dense MXU matmul against CW[ky] (upsample-in-W + horizontal taps +
    # channel mix folded).  acc seeded by the ky=0 dot (no zeros materialization).
    def tap(ky):
        return jnp.concatenate([r[ky * H2:(ky + 1) * H2, :] for r in r_list], axis=0)

    acc = jnp.dot(tap(0), cw_ref[0], preferred_element_type=jnp.float32)
    for ky in (1, 2):
        acc = acc + jnp.dot(tap(ky), cw_ref[ky], preferred_element_type=jnp.float32)

    # BN1 (conv bias + eval-mode BN folded) + ReLU, kept in f32 on the VPU.
    h = jnp.maximum(acc * s1_ref[...] + b1_ref[...], 0.0)       # (NB*H2, W2*Cmid)

    # 1x1 conv as h @ kron(I_W2, w2): keeps the output lane dim at W2*Cout (lane-dense).
    out = jnp.dot(h.astype(cdt), w2k_ref[...], preferred_element_type=jnp.float32)

    # BN2 + ReLU (f32), then full-width stores, one sublane-aligned slice per image.
    out = jnp.maximum(out * s2_ref[...] + b2_ref[...], 0.0)     # (NB*H2, W2*Cout)
    for i in range(NB):
        o_ref[i] = out[i * H2:(i + 1) * H2, :].astype(o_ref.dtype)


# ----------------------------------------------------------------------------- wrapper
def _const_spec(arr):
    nd = arr.ndim
    idx = lambda n, _nd=nd: (0,) * _nd
    # Constants: single-buffer to halve resident constant VMEM (v7x has 64 MiB VMEM).
    if hasattr(pl, "Buffered"):
        try:
            return pl.BlockSpec(arr.shape, idx, pipeline_mode=pl.Buffered(1))
        except TypeError:           # older BlockSpec without pipeline_mode kwarg
            pass
    return pl.BlockSpec(arr.shape, idx)


def _pick_nb(N, H2, m_target=256, min_steps=4):
    """Largest NB dividing N with NB*H2 <= m_target; prefer keeping >= min_steps grid
    steps (v7x: >=2 steps per TensorCore) when the batch is large enough."""
    cap = max(1, m_target // H2)
    divs = [d for d in range(min(N, cap), 0, -1) if N % d == 0]
    if not divs:
        return 1
    for d in divs:
        if N // d >= min_steps:
            return d
    return divs[0]


def upblock_pallas(x_flat, AH, CW, s1t, b1t, W2K, s2t, b2t, *,
                   nb=None, out_dtype=jnp.float32):
    """x_flat: (N, H, W*C) f32 lane-dense.  Returns (N, H2, W2*Cout) in out_dtype."""
    N, H, WC = x_flat.shape
    H2 = AH.shape[0] // 3
    WCout = s2t.shape[1]
    # Sublane alignment of the per-tap H2-row slices (and bf16 row packing).
    assert H % 4 == 0, "H must be a multiple of 4 (so H2 slices are sublane-aligned)"
    if nb is None:
        nb = _pick_nb(N, H2)
    assert N % nb == 0, f"batch {N} must be divisible by NB={nb}"
    grid = (N // nb,)
    return pl.pallas_call(
        upblock_kernel,
        out_shape=jax.ShapeDtypeStruct((N, H2, WCout), out_dtype),
        grid=grid,
        in_specs=[
            pl.BlockSpec((nb, H, WC), lambda n: (n, 0, 0)),    # NB images per step
            _const_spec(AH), _const_spec(CW),
            _const_spec(s1t), _const_spec(b1t),
            _const_spec(W2K),
            _const_spec(s2t), _const_spec(b2t),
        ],
        out_specs=pl.BlockSpec((nb, H2, WCout), lambda n: (n, 0, 0)),
        compiler_params=pltpu.CompilerParams(
            dimension_semantics=("parallel",)),                # batch independent
    )(x_flat, AH, CW, s1t, b1t, W2K, s2t, b2t)


def build_upblock_operands(wt1, bias1, g1, be1, m1, v1,
                           wt2, bias2, g2, be2, m2, v2,
                           H, W, C, eps=1e-5, compute_dtype=jnp.bfloat16):
    """Fold upsample matrices, conv weights, conv bias and eval-mode BN into the
    lane-dense operator set consumed by the kernel.  All folds done in float64."""
    Cmid = int(np.asarray(wt1).shape[0])
    Cout = int(np.asarray(wt2).shape[0])
    H2, W2 = 2 * H, 2 * W

    ah = _bilinear_matrix(H, H2)                 # (H2, H)
    awT = _bilinear_matrix(W, W2).T              # (W, W2)

    # Shifted row-interp matrices for the three vertical conv taps (offsets -1, 0, +1).
    AH = np.zeros((3, H2, H), np.float64)
    for ky in range(3):
        lo = max(0, 1 - ky)
        hi = min(H2, H2 + 1 - ky)
        AH[ky, lo:hi, :] = ah[lo + ky - 1: hi + ky - 1, :]
    AH = AH.reshape(3 * H2, H)

    # Column interpolation with channels interleaved on lanes: kron(awT, I_C).
    aw_kron = np.kron(awT, np.eye(C))            # (W*C, W2*C)

    # Per-tap banded matrices B_ky folding the horizontal taps + channel mixing.
    w1_hwio = np.transpose(np.asarray(wt1, np.float64), (2, 3, 1, 0))   # (3,3,Cin,Cmid)
    B = np.zeros((3, W2 * C, W2 * Cmid), np.float64)
    for ky in range(3):
        for kx in range(3):
            for q in range(W2):
                w_in = q + kx - 1
                if 0 <= w_in < W2:
                    B[ky, w_in * C:(w_in + 1) * C, q * Cmid:(q + 1) * Cmid] += w1_hwio[ky, kx]
    CW = np.einsum('ab,kbc->kac', aw_kron, B)    # (3, W*C, W2*Cmid)

    # 1x1 conv replicated over W2 output positions: kron(I_W2, w2).
    w2_mat = np.asarray(wt2, np.float64).reshape(Cout, Cmid).T           # (Cmid, Cout)
    W2K = np.kron(np.eye(W2), w2_mat)            # (W2*Cmid, W2*Cout)

    # Conv bias + eval-mode BN folded into per-channel scale/shift, tiled lane-dense.
    s1 = np.asarray(g1, np.float64) / np.sqrt(np.asarray(v1, np.float64) + eps)
    b1 = (np.asarray(bias1, np.float64) - np.asarray(m1, np.float64)) * s1 \
         + np.asarray(be1, np.float64)
    s2 = np.asarray(g2, np.float64) / np.sqrt(np.asarray(v2, np.float64) + eps)
    b2 = (np.asarray(bias2, np.float64) - np.asarray(m2, np.float64)) * s2 \
         + np.asarray(be2, np.float64)
    s1t = np.tile(s1, W2).reshape(1, W2 * Cmid)
    b1t = np.tile(b1, W2).reshape(1, W2 * Cmid)
    s2t = np.tile(s2, W2).reshape(1, W2 * Cout)
    b2t = np.tile(b2, W2).reshape(1, W2 * Cout)

    cdt = compute_dtype
    return (jnp.asarray(AH, cdt), jnp.asarray(CW, cdt),
            jnp.asarray(s1t, jnp.float32), jnp.asarray(b1t, jnp.float32),
            jnp.asarray(W2K, cdt),
            jnp.asarray(s2t, jnp.float32), jnp.asarray(b2t, jnp.float32))


# ----------------------------------------------------------------------------- reference
def upblock_ref(x_nhwc, ah, awT, w1_hwio, bias1, g1, be1, m1, v1,
                w2_hwio, bias2, g2, be2, m2, v2, eps=1e-5):
    """Pure-JAX f32 reference with identical (eval-mode BN) semantics."""
    up = jnp.einsum('ph,nhwc->npwc', ah, x_nhwc)
    up = jnp.einsum('wq,npwc->npqc', awT, up)
    dn = ('NHWC', 'HWIO', 'NHWC')
    y = jax.lax.conv_general_dilated(up, w1_hwio, (1, 1), 'SAME',
                                     dimension_numbers=dn) + bias1
    y = (y - m1) / jnp.sqrt(v1 + eps) * g1 + be1
    y = jnp.maximum(y, 0.0)
    y = jax.lax.conv_general_dilated(y, w2_hwio, (1, 1), 'SAME',
                                     dimension_numbers=dn) + bias2
    y = (y - m2) / jnp.sqrt(v2 + eps) * g2 + be2
    return jnp.maximum(y, 0.0)


if __name__ == "__main__":
    N, Cin, H, W = 2, 4, 16, 16          # x: (N, C, H, W) as PyTorch would see it
    Cmid, Cout = Cin, 8                  # mid_channels = in_channels
    H2, W2 = 2 * H, 2 * W
    eps = 1e-5

    key = jax.random.PRNGKey(0)
    ks = jax.random.split(key, 12)
    x_nchw = jax.random.normal(ks[0], (N, Cin, H, W), jnp.float32)

    # conv1: 3x3, Cin -> Cmid  (torch layout O,I,kH,kW)
    wt1 = 0.1 * jax.random.normal(ks[1], (Cmid, Cin, 3, 3), jnp.float32)
    bias1 = 0.1 * jax.random.normal(ks[2], (Cmid,), jnp.float32)
    g1 = 0.5 + jax.random.uniform(ks[3], (Cmid,), jnp.float32)
    be1 = 0.1 * jax.random.normal(ks[4], (Cmid,), jnp.float32)
    m1 = 0.1 * jax.random.normal(ks[5], (Cmid,), jnp.float32)
    v1 = 0.5 + jax.random.uniform(ks[6], (Cmid,), jnp.float32)

    # conv2: 1x1, Cmid -> Cout
    wt2 = 0.1 * jax.random.normal(ks[7], (Cout, Cmid, 1, 1), jnp.float32)
    bias2 = 0.1 * jax.random.normal(ks[8], (Cout,), jnp.float32)
    g2 = 0.5 + jax.random.uniform(ks[9], (Cout,), jnp.float32)
    be2 = 0.1 * jax.random.normal(ks[10], (Cout,), jnp.float32)
    m2 = 0.1 * jax.random.normal(ks[11], (Cout,), jnp.float32)
    v2 = 0.5 + jax.random.uniform(jax.random.PRNGKey(1), (Cout,), jnp.float32)

    # layout glue (plain JAX, outside the kernel)
    x_nhwc = jnp.transpose(x_nchw, (0, 2, 3, 1))           # NCHW -> NHWC
    x_flat = x_nhwc.reshape(N, H, W * Cin)                 # lane-dense (free row-major reshape)

    # f32 reference
    ah_f32 = jnp.asarray(_bilinear_matrix(H, H2), jnp.float32)
    awT_f32 = jnp.asarray(_bilinear_matrix(W, W2).T, jnp.float32)
    w1_hwio = jnp.transpose(wt1, (2, 3, 1, 0))
    w2_hwio = jnp.transpose(wt2, (2, 3, 1, 0))
    ref = upblock_ref(x_nhwc, ah_f32, awT_f32, w1_hwio, bias1, g1, be1, m1, v1,
                      w2_hwio, bias2, g2, be2, m2, v2, eps)
    ref = jax.block_until_ready(ref)

    # 1) semantic check: f32 MXU operands, f32 output -> matches the f32 reference tightly.
    ops_f32 = build_upblock_operands(wt1, bias1, g1, be1, m1, v1,
                                     wt2, bias2, g2, be2, m2, v2,
                                     H, W, Cin, eps, compute_dtype=jnp.float32)
    out_f32 = upblock_pallas(x_flat, *ops_f32,
                             out_dtype=jnp.float32).reshape(N, H2, W2, Cout)
    out_f32 = jax.block_until_ready(out_f32)
    assert out_f32.shape == (N, H2, W2, Cout)
    np.testing.assert_allclose(np.asarray(out_f32), np.asarray(ref),
                               rtol=1e-4, atol=1e-4)

    # 2) performance config: bf16 MXU operands (f32 accumulation + f32 BN/ReLU on the
    #    VPU), bf16 output store, NB-batched grid steps.  bf16 rounding of operands /
    #    intermediates / output gives ~1e-2-level deviations vs. the f32 reference,
    #    hence the wider tolerance (the f32 path above is the tight check).
    ops_bf16 = build_upblock_operands(wt1, bias1, g1, be1, m1, v1,
                                      wt2, bias2, g2, be2, m2, v2,
                                      H, W, Cin, eps, compute_dtype=jnp.bfloat16)
    out_bf16 = upblock_pallas(x_flat, *ops_bf16,
                              out_dtype=jnp.bfloat16).reshape(N, H2, W2, Cout)
    out_bf16 = jax.block_until_ready(out_bf16)
    assert out_bf16.shape == (N, H2, W2, Cout)
    np.testing.assert_allclose(np.asarray(out_bf16.astype(jnp.float32)),
                               np.asarray(ref), rtol=5e-2, atol=5e-2)

    print("KERNEL_OK")
</pallas_src>

<mosaic_0001>
module attributes {stable_mosaic.version = 11 : i64} {
  func.func @upblock_kernel(%arg0: i32, %arg1: memref<2x16x64xf32, #tpu.memory_space<vmem>>, %arg2: memref<96x16xf32, #tpu.memory_space<vmem>>, %arg3: memref<3x64x128xf32, #tpu.memory_space<vmem>>, %arg4: memref<1x128xf32, #tpu.memory_space<vmem>>, %arg5: memref<1x128xf32, #tpu.memory_space<vmem>>, %arg6: memref<128x256xf32, #tpu.memory_space<vmem>>, %arg7: memref<1x256xf32, #tpu.memory_space<vmem>>, %arg8: memref<1x256xf32, #tpu.memory_space<vmem>>, %arg9: memref<2x32x256xf32, #tpu.memory_space<vmem>>) attributes {dimension_semantics = [#tpu.dimension_semantics<parallel>], iteration_bounds = array<i64: 1>, scalar_prefetch = 0 : i64, scratch_operands = 0 : i64, tpu.core_type = #tpu.core_type<tc>, window_params = [{transform_indices = @transform_0, window_bounds = array<i64: 2, 16, 64>}, {pipeline_mode = #tpu.pipeline_mode<synchronous>, transform_indices = @transform_1, window_bounds = array<i64: 96, 16>}, {pipeline_mode = #tpu.pipeline_mode<synchronous>, transform_indices = @transform_2, window_bounds = array<i64: 3, 64, 128>}, {pipeline_mode = #tpu.pipeline_mode<synchronous>, transform_indices = @transform_3, window_bounds = array<i64: 1, 128>}, {pipeline_mode = #tpu.pipeline_mode<synchronous>, transform_indices = @transform_4, window_bounds = array<i64: 1, 128>}, {pipeline_mode = #tpu.pipeline_mode<synchronous>, transform_indices = @transform_5, window_bounds = array<i64: 128, 256>}, {pipeline_mode = #tpu.pipeline_mode<synchronous>, transform_indices = @transform_6, window_bounds = array<i64: 1, 256>}, {pipeline_mode = #tpu.pipeline_mode<synchronous>, transform_indices = @transform_7, window_bounds = array<i64: 1, 256>}, {transform_indices = @transform_8, window_bounds = array<i64: 2, 32, 256>}]} {
    %c0 = arith.constant 0 : index
    %c0_0 = arith.constant 0 : index
    %0 = vector.load %arg2[%c0, %c0_0] : memref<96x16xf32, #tpu.memory_space<vmem>>, vector<96x16xf32>
    %c0_1 = arith.constant 0 : index
    %c0_2 = arith.constant 0 : index
    %c0_3 = arith.constant 0 : index
    %1 = vector.load %arg1[%c0_1, %c0_2, %c0_3] : memref<2x16x64xf32, #tpu.memory_space<vmem>>, vector<1x16x64xf32>
    %2 = vector.shape_cast %1 : vector<1x16x64xf32> to vector<16x64xf32>
    %cst = arith.constant dense<0.000000e+00> : vector<96x64xf32>
    %3 = tpu.matmul %0, %2, %cst {dimension_numbers = #tpu.dot_dimension_numbers<[1], [0], [0], [1], [0, 0, 1, 1], [], []>} : vector<96x16xf32>, vector<16x64xf32>, vector<96x64xf32> -> vector<96x64xf32>
    %c0_4 = arith.constant 0 : index
    %c0_5 = arith.constant 0 : index
    %4 = vector.load %arg2[%c0_4, %c0_5] : memref<96x16xf32, #tpu.memory_space<vmem>>, vector<96x16xf32>
    %c1 = arith.constant 1 : index
    %c0_6 = arith.constant 0 : index
    %c0_7 = arith.constant 0 : index
    %5 = vector.load %arg1[%c1, %c0_6, %c0_7] : memref<2x16x64xf32, #tpu.memory_space<vmem>>, vector<1x16x64xf32>
    %6 = vector.shape_cast %5 : vector<1x16x64xf32> to vector<16x64xf32>
    %cst_8 = arith.constant dense<0.000000e+00> : vector<96x64xf32>
    %7 = tpu.matmul %4, %6, %cst_8 {dimension_numbers = #tpu.dot_dimension_numbers<[1], [0], [0], [1], [0, 0, 1, 1], [], []>} : vector<96x16xf32>, vector<16x64xf32>, vector<96x64xf32> -> vector<96x64xf32>
    %8 = vector.extract_strided_slice %3 {offsets = [0, 0], sizes = [32, 64], strides = [1, 1]} : vector<96x64xf32> to vector<32x64xf32>
    %9 = vector.extract_strided_slice %7 {offsets = [0, 0], sizes = [32, 64], strides = [1, 1]} : vector<96x64xf32> to vector<32x64xf32>
    %10 = tpu.concatenate %8, %9 in 0 : vector<32x64xf32>, vector<32x64xf32> -> vector<64x64xf32>
    %c0_9 = arith.constant 0 : index
    %c0_10 = arith.constant 0 : index
    %c0_11 = arith.constant 0 : index
    %11 = vector.load %arg3[%c0_9, %c0_10, %c0_11] : memref<3x64x128xf32, #tpu.memory_space<vmem>>, vector<1x64x128xf32>
    %12 = vector.shape_cast %11 : vector<1x64x128xf32> to vector<64x128xf32>
    %cst_12 = arith.constant dense<0.000000e+00> : vector<64x128xf32>
    %13 = tpu.matmul %10, %12, %cst_12 {dimension_numbers = #tpu.dot_dimension_numbers<[1], [0], [0], [1], [0, 0, 1, 1], [], []>} : vector<64x64xf32>, vector<64x128xf32>, vector<64x128xf32> -> vector<64x128xf32>
    %14 = vector.extract_strided_slice %3 {offsets = [32, 0], sizes = [32, 64], strides = [1, 1]} : vector<96x64xf32> to vector<32x64xf32>
    %15 = vector.extract_strided_slice %7 {offsets = [32, 0], sizes = [32, 64], strides = [1, 1]} : vector<96x64xf32> to vector<32x64xf32>
    %16 = tpu.concatenate %14, %15 in 0 : vector<32x64xf32>, vector<32x64xf32> -> vector<64x64xf32>
    %c1_13 = arith.constant 1 : index
    %c0_14 = arith.constant 0 : index
    %c0_15 = arith.constant 0 : index
    %17 = vector.load %arg3[%c1_13, %c0_14, %c0_15] : memref<3x64x128xf32, #tpu.memory_space<vmem>>, vector<1x64x128xf32>
    %18 = vector.shape_cast %17 : vector<1x64x128xf32> to vector<64x128xf32>
    %cst_16 = arith.constant dense<0.000000e+00> : vector<64x128xf32>
    %19 = tpu.matmul %16, %18, %cst_16 {dimension_numbers = #tpu.dot_dimension_numbers<[1], [0], [0], [1], [0, 0, 1, 1], [], []>} : vector<64x64xf32>, vector<64x128xf32>, vector<64x128xf32> -> vector<64x128xf32>
    %20 = arith.addf %13, %19 : vector<64x128xf32>
    %21 = vector.extract_strided_slice %3 {offsets = [64, 0], sizes = [32, 64], strides = [1, 1]} : vector<96x64xf32> to vector<32x64xf32>
    %22 = vector.extract_strided_slice %7 {offsets = [64, 0], sizes = [32, 64], strides = [1, 1]} : vector<96x64xf32> to vector<32x64xf32>
    %23 = tpu.concatenate %21, %22 in 0 : vector<32x64xf32>, vector<32x64xf32> -> vector<64x64xf32>
    %c2 = arith.constant 2 : index
    %c0_17 = arith.constant 0 : index
    %c0_18 = arith.constant 0 : index
    %24 = vector.load %arg3[%c2, %c0_17, %c0_18] : memref<3x64x128xf32, #tpu.memory_space<vmem>>, vector<1x64x128xf32>
    %25 = vector.shape_cast %24 : vector<1x64x128xf32> to vector<64x128xf32>
    %cst_19 = arith.constant dense<0.000000e+00> : vector<64x128xf32>
    %26 = tpu.matmul %23, %25, %cst_19 {dimension_numbers = #tpu.dot_dimension_numbers<[1], [0], [0], [1], [0, 0, 1, 1], [], []>} : vector<64x64xf32>, vector<64x128xf32>, vector<64x128xf32> -> vector<64x128xf32>
    %27 = arith.addf %20, %26 : vector<64x128xf32>
    %c0_20 = arith.constant 0 : index
    %c0_21 = arith.constant 0 : index
    %28 = vector.load %arg4[%c0_20, %c0_21] : memref<1x128xf32, #tpu.memory_space<vmem>>, vector<1x128xf32>
    %29 = vector.broadcast %28 : vector<1x128xf32> to vector<64x128xf32>
    %30 = arith.mulf %27, %29 : vector<64x128xf32>
    %c0_22 = arith.constant 0 : index
    %c0_23 = arith.constant 0 : index
    %31 = vector.load %arg5[%c0_22, %c0_23] : memref<1x128xf32, #tpu.memory_space<vmem>>, vector<1x128xf32>
    %32 = vector.broadcast %31 : vector<1x128xf32> to vector<64x128xf32>
    %33 = arith.addf %30, %32 : vector<64x128xf32>
    %cst_24 = arith.constant 0.000000e+00 : f32
    %34 = vector.broadcast %cst_24 : f32 to vector<64x128xf32>
    %35 = arith.maximumf %33, %34 : vector<64x128xf32>
    %c0_25 = arith.constant 0 : index
    %c0_26 = arith.constant 0 : index
    %36 = vector.load %arg6[%c0_25, %c0_26] : memref<128x256xf32, #tpu.memory_space<vmem>>, vector<128x256xf32>
    %cst_27 = arith.constant dense<0.000000e+00> : vector<64x256xf32>
    %37 = tpu.matmul %35, %36, %cst_27 {dimension_numbers = #tpu.dot_dimension_numbers<[1], [0], [0], [1], [0, 0, 1, 1], [], []>} : vector<64x128xf32>, vector<128x256xf32>, vector<64x256xf32> -> vector<64x256xf32>
    %c0_28 = arith.constant 0 : index
    %c0_29 = arith.constant 0 : index
    %38 = vector.load %arg7[%c0_28, %c0_29] : memref<1x256xf32, #tpu.memory_space<vmem>>, vector<1x256xf32>
    %39 = vector.broadcast %38 : vector<1x256xf32> to vector<64x256xf32>
    %40 = arith.mulf %37, %39 : vector<64x256xf32>
    %c0_30 = arith.constant 0 : index
    %c0_31 = arith.constant 0 : index
    %41 = vector.load %arg8[%c0_30, %c0_31] : memref<1x256xf32, #tpu.memory_space<vmem>>, vector<1x256xf32>
    %42 = vector.broadcast %41 : vector<1x256xf32> to vector<64x256xf32>
    %43 = arith.addf %40, %42 : vector<64x256xf32>
    %cst_32 = arith.constant 0.000000e+00 : f32
    %44 = vector.broadcast %cst_32 : f32 to vector<64x256xf32>
    %45 = arith.maximumf %43, %44 : vector<64x256xf32>
    %46 = vector.extract_strided_slice %45 {offsets = [0, 0], sizes = [32, 256], strides = [1, 1]} : vector<64x256xf32> to vector<32x256xf32>
    %c0_33 = arith.constant 0 : index
    %c0_34 = arith.constant 0 : index
    %c0_35 = arith.constant 0 : index
    %47 = vector.load %arg9[%c0_33, %c0_34, %c0_35] : memref<2x32x256xf32, #tpu.memory_space<vmem>>, vector<1x32x256xf32>
    %48 = vector.shape_cast %47 : vector<1x32x256xf32> to vector<32x256xf32>
    %49 = vector.shape_cast %46 : vector<32x256xf32> to vector<1x32x256xf32>
    tpu.vector_store %arg9[%c0_33, %c0_34, %c0_35], %49 {strides = array<i32>} : memref<2x32x256xf32, #tpu.memory_space<vmem>>, vector<1x32x256xf32>,
    %50 = vector.extract_strided_slice %45 {offsets = [32, 0], sizes = [32, 256], strides = [1, 1]} : vector<64x256xf32> to vector<32x256xf32>
    %c1_36 = arith.constant 1 : index
    %c0_37 = arith.constant 0 : index
    %c0_38 = arith.constant 0 : index
    %51 = vector.load %arg9[%c1_36, %c0_37, %c0_38] : memref<2x32x256xf32, #tpu.memory_space<vmem>>, vector<1x32x256xf32>
    %52 = vector.shape_cast %51 : vector<1x32x256xf32> to vector<32x256xf32>
    %53 = vector.shape_cast %50 : vector<32x256xf32> to vector<1x32x256xf32>
    tpu.vector_store %arg9[%c1_36, %c0_37, %c0_38], %53 {strides = array<i32>} : memref<2x32x256xf32, #tpu.memory_space<vmem>>, vector<1x32x256xf32>,
    return
  }
  func.func @transform_0(%arg0: i32) -> (i32, i32, i32) {
    %c0_i32 = arith.constant 0 : i32
    %c0_i32_0 = arith.constant 0 : i32
    %c0_i32_1 = arith.constant 0 : i32
    return %arg0, %c0_i32, %c0_i32_0 : i32, i32, i32
  }
  func.func @transform_1(%arg0: i32) -> (i32, i32) {
    %c0_i32 = arith.constant 0 : i32
    %c0_i32_0 = arith.constant 0 : i32
    %c0_i32_1 = arith.constant 0 : i32
    return %c0_i32, %c0_i32_0 : i32, i32
  }
  func.func @transform_2(%arg0: i32) -> (i32, i32, i32) {
    %c0_i32 = arith.constant 0 : i32
    %c0_i32_0 = arith.constant 0 : i32
    %c0_i32_1 = arith.constant 0 : i32
    %c0_i32_2 = arith.constant 0 : i32
    return %c0_i32, %c0_i32_0, %c0_i32_1 : i32, i32, i32
  }
  func.func @transform_3(%arg0: i32) -> (i32, i32) {
    %c0_i32 = arith.constant 0 : i32
    %c0_i32_0 = arith.constant 0 : i32
    %c0_i32_1 = arith.constant 0 : i32
    return %c0_i32, %c0_i32_0 : i32, i32
  }
  func.func @transform_4(%arg0: i32) -> (i32, i32) {
    %c0_i32 = arith.constant 0 : i32
    %c0_i32_0 = arith.constant 0 : i32
    %c0_i32_1 = arith.constant 0 : i32
    return %c0_i32, %c0_i32_0 : i32, i32
  }
  func.func @transform_5(%arg0: i32) -> (i32, i32) {
    %c0_i32 = arith.constant 0 : i32
    %c0_i32_0 = arith.constant 0 : i32
    %c0_i32_1 = arith.constant 0 : i32
    return %c0_i32, %c0_i32_0 : i32, i32
  }
  func.func @transform_6(%arg0: i32) -> (i32, i32) {
    %c0_i32 = arith.constant 0 : i32
    %c0_i32_0 = arith.constant 0 : i32
    %c0_i32_1 = arith.constant 0 : i32
    return %c0_i32, %c0_i32_0 : i32, i32
  }
  func.func @transform_7(%arg0: i32) -> (i32, i32) {
    %c0_i32 = arith.constant 0 : i32
    %c0_i32_0 = arith.constant 0 : i32
    %c0_i32_1 = arith.constant 0 : i32
    return %c0_i32, %c0_i32_0 : i32, i32
  }
  func.func @transform_8(%arg0: i32) -> (i32, i32, i32) {
    %c0_i32 = arith.constant 0 : i32
    %c0_i32_0 = arith.constant 0 : i32
    %c0_i32_1 = arith.constant 0 : i32
    return %arg0, %c0_i32, %c0_i32_0 : i32, i32, i32
  }
}

</mosaic_0001>

<bundles_post_ra>
// kernel: tpu_custom_call.1
= control target key start
LH: loop header
LB: loop body
LE: loop exit
PB: predicated region body
PF: predicated region fallthrough
CT: control target
= control target key end

     0   :  { %13 = vsyncpa [#allocation3], 0  ;;  %s1644_s0 = inlined_call_operand.vmem [shape: f32[2,16,64], index: 0, kind: input, shape index: {}]   ;;  %s1645_s1 = inlined_call_operand.vmem [shape: f32[96,16], index: 1, kind: input, shape index: {}]   ;;  %s1646_s2 = inlined_call_operand.hbm [shape: f32[3,64,128], index: 2, kind: input, shape index: {}]   ;;  %s1647_s3 = inlined_call_operand.vmem [shape: f32[1,128], index: 3, kind: input, shape index: {}]   ;;  %s1648_s4 = inlined_call_operand.vmem [shape: f32[1,128], index: 4, kind: input, shape index: {}]   ;;  %s1649_s5 = inlined_call_operand.hbm [shape: f32[128,256], index: 5, kind: input, shape index: {}]   ;;  %s1650_s6 = inlined_call_operand.vmem [shape: f32[1,256], index: 6, kind: input, shape index: {}]   ;;  %s1651_s7 = inlined_call_operand.vmem [shape: f32[1,256], index: 7, kind: input, shape index: {}]   ;;  %s1652_s8 = inlined_call_operand.hbm [shape: f32[2,32,256], index: 8, kind: output, shape index: {}]  }
   0x1   :  { %14 = vsyncpa [#allocation6], 0 }
   0x2   :  { %15 = vsyncpa [#allocation4], 0  ;;  %s1408_s27 = smov [#allocation2]  }
   0x3   :  { %s25_s28 = sshll.u32 %s1408_s27, 4  ;;  %s26_s28 = int_to_ptr.vmem [resolvable:$true] %s25_s28 }
   0x4   :  { %s1350_s29 = scalar_lea.vmem %s26_s28, 3072  ;;  %p1355_p1 = scmp.lt.s32.totalorder %s26_s28, %s26_s28 }
   0x5   :  { %p1351_p0 = scmp.ne.s32.totalorder %s26_s28, %s1350_s29  ;;  %p1356_p2 = scmp.lt.s32.totalorder %s1350_s29, %s1350_s29 }
   0x7   :  { %p1357_p3 = por %p1356_p2, %p1355_p1 }
   0x9   :  { %p1358_p4 = pnand %p1357_p3, %p1351_p0 }
   0xb   :  { %1361 = shalt.err (!%p1358_p4)
}
   0xc   :  { %s1409_s30 = smov 128   ;;  %s1410_s9 = smov 8  }
   0xd   :  { %31 = dma.hbm_to_vmem [thread:$0]  %s1646_s2, 3072, %s26_s28, [#allocation3], %s1409_s30, %s1409_s30, %s1410_s9  }
   0xe   :  { %s1411_s12 = smov [#allocation5]  }
   0xf   :  { %s41_s13 = sshll.u32 %s1411_s12, 4  ;;  %s42_s13 = int_to_ptr.vmem [resolvable:$true] %s41_s13 }
  0x10   :  { %s1370_s14 = scalar_lea.vmem %s42_s13, 4096  ;;  %p1375_p6 = scmp.lt.s32.totalorder %s42_s13, %s42_s13 }
  0x11   :  { %p1371_p5 = scmp.ne.s32.totalorder %s42_s13, %s1370_s14  ;;  %p1376_p7 = scmp.lt.s32.totalorder %s1370_s14, %s1370_s14 }
  0x13   :  { %p1377_p8 = por %p1376_p7, %p1375_p6 }
  0x15   :  { %p1378_p9 = pnand %p1377_p8, %p1371_p5 }
  0x17   :  { %1381 = shalt.err (!%p1378_p9)
}
  0x18   :  { %s1412_s15 = smov 256   ;;  %s1413_s16 = smov 16  }
  0x19   :  { %47 = dma.hbm_to_vmem [thread:$0]  %s1649_s5, 4096, %s42_s13, [#allocation6], %s1412_s15, %s1412_s15, %s1413_s16  }
  0x1a   :  { %1402 = dma.done.wait [#allocation3], 3072  }
  0x1b   :  { %1403 = vsyncadd [#allocation3], 4294964224 }
  0x1c   :  { %1404 = dma.done.wait [#allocation6], 4096  }
  0x1d   :  { %1405 = vsyncadd [#allocation6], 4294963200  ;;  %v71_v0 = vld [vmem:[%s1644_s0 + $0x8] sm:$0xff]  ;;  %v70_v1 = vld [vmem:[%s1644_s0] sm:$0xff]  ;;  %vm72_vm0 = vcmask 130048   ;;  %vm379_vm1 = vcmask 523264  }
  0x1e   :  { %v58_v2 = vld [vmem:[%s1645_s1] sm:$0xff]  ;;  %1202 = vmatprep.subr.mxu0 %v71_v0  ;;  %1330 = vmatprep.subr.mxu1 %v71_v0  ;;  %v59_v3 = vld [vmem:[%s1645_s1 + $0x8] sm:$0xff]  ;;  %v68_v4 = vld [vmem:[%s1645_s1 + $0x50] sm:$0xff] }
  0x1f   :  { %1203 = vmatpush3.msra.mxu0 %v71_v0  ;;  %1332 = vmatpush3.msra.mxu1 %v71_v0  ;;  %v1087_v5 = vld [vmem:[%s1644_s0 + $0x18] sm:$0xff]  ;;  %v60_v7 = vld [vmem:[%s1645_s1 + $0x10] sm:$0xff]  ;;  %v62_v10 = vld [vmem:[%s1645_s1 + $0x20] sm:$0xff] }
  0x20   :  { %1204 = vmatprep.subr.mxu0 %v70_v1  ;;  %1206 = vmatprep.mubr.msk.f32.mxu0 %vm72_vm0, %v58_v2  ;;  %v69_v6 = vld [vmem:[%s1645_s1 + $0x58] sm:$0xff]  ;;  %v1086_v9 = vld [vmem:[%s1644_s0 + $0x10] sm:$0xff]  ;;  %v63_v12 = vld [vmem:[%s1645_s1 + $0x28] sm:$0xff] }
  0x21   :  { %1205 = vmatpush3.msra.mxu0 %v70_v1  ;;  %1331 = vmatprep.subr.mxu1 %v70_v1  ;;  %v61_v8 = vld [vmem:[%s1645_s1 + $0x18] sm:$0xff]  ;;  %v377_v13 = vld [vmem:[#allocation2 + $0x70] sm:$0xff]  ;;  %v376_v15 = vld [vmem:[#allocation2 + $0x68] sm:$0xff] }
  0x22   :  { %1207 = vmatmul.mubr.msk.f32.vlgmr.msra.gmra.mxu0 %vm72_vm0, %v59_v3  ;;  %1333 = vmatpush3.msra.mxu1 %v70_v1  ;;  %v378_v11 = vld [vmem:[#allocation2 + $0x78] sm:$0xff]  ;;  %v64_v14 = vld [vmem:[%s1645_s1 + $0x30] sm:$0xff]  ;;  %v375_v17 = vld [vmem:[#allocation2 + $0x60] sm:$0xff] }
  0x23   :  { %1221 = vmatprep.mubr.msk.f32.mxu1 %vm72_vm0, %v68_v4  ;;  %1224 = vmatprep.subr.mxu1 %v1087_v5  ;;  %v65_v16 = vld [vmem:[%s1645_s1 + $0x38] sm:$0xff]  ;;  %v66_v18 = vld [vmem:[%s1645_s1 + $0x40] sm:$0xff]  ;;  %v67_v19 = vld [vmem:[%s1645_s1 + $0x48] sm:$0xff] }
  0x24   :  { %1222 = vmatmul.mubr.msk.f32.vlgmr.msra.gmra.mxu1 %vm72_vm0, %v69_v6  ;;  %1209 = vmatprep.mubr.msk.f32.mxu0 %vm72_vm0, %v60_v7  ;;  %v374_v20 = vld [vmem:[#allocation2 + $0x58] sm:$0xff]  ;;  %v373_v21 = vld [vmem:[#allocation2 + $0x50] sm:$0xff]  ;;  %v372_v22 = vld [vmem:[#allocation2 + $0x48] sm:$0xff] }
  0x25   :  { %1225 = vmatpush3.msra.mxu1 %v1087_v5  ;;  %1228 = vmatprep.mubr.msk.f32.mxu1 %vm72_vm0, %v58_v2  ;;  %v371_v23 = vld [vmem:[#allocation2 + $0x40] sm:$0xff]  ;;  %v369_v24 = vld [vmem:[#allocation2 + $0x38] sm:$0xff]  ;;  %v368_v36 = vld [vmem:[#allocation2 + $0x30] sm:$0xff] }
  0x26   :  { %1210 = vmatmul.mubr.msk.f32.gmra.mxu0 %vm72_vm0, %v61_v8  ;;  %1226 = vmatprep.subr.mxu1 %v1086_v9  ;;  %v367_v39 = vld [vmem:[#allocation2 + $0x28] sm:$0xff]  ;;  %v366_v42 = vld [vmem:[#allocation2 + $0x20] sm:$0xff]  ;;  %v365_v44 = vld [vmem:[#allocation2 + $0x18] sm:$0xff] }
  0x27   :  { %1227 = vmatpush3.msra.mxu1 %v1086_v9  ;;  %1212 = vmatprep.mubr.msk.f32.mxu0 %vm72_vm0, %v62_v10  ;;  %v364_v46 = vld [vmem:[#allocation2 + $0x10] sm:$0xff]  ;;  %v363_v48 = vld [vmem:[#allocation2 + $0x8] sm:$0xff]  ;;  %v362_v49 = vld [vmem:[#allocation2] sm:$0xff] }
  0x28   :  { %1229 = vmatmul.mubr.msk.f32.vlgmr.msra.gmra.mxu1 %vm72_vm0, %v59_v3  ;;  %1246 = vmatprep.subr.mxu0 %v378_v11  ;;  %v646_v50 = vld [vmem:[#allocation2 + $0xb8] sm:$0xff]  ;;  %v645_v51 = vld [vmem:[#allocation2 + $0xb0] sm:$0xff]  ;;  %v644_v52 = vld [vmem:[#allocation2 + $0xa8] sm:$0xff] }
  0x29   :  { %1231 = vmatprep.mubr.msk.f32.mxu1 %vm72_vm0, %v60_v7  ;;  %1247 = vmatpush3.msra.mxu0 %v378_v11  ;;  %v643_v53 = vld [vmem:[#allocation2 + $0xa0] sm:$0xff]  ;;  %v642_v54 = vld [vmem:[#allocation2 + $0x98] sm:$0xff]  ;;  %v641_v56 = vld [vmem:[#allocation2 + $0x90] sm:$0xff] }
  0x2a   :  { %1213 = vmatmul.mubr.msk.f32.gmra.mxu0 %vm72_vm0, %v63_v12  ;;  %1248 = vmatprep.subr.mxu0 %v377_v13  ;;  %v640_v57 = vld [vmem:[#allocation2 + $0x88] sm:$0xff]  ;;  %v639_v60 = vld [vmem:[#allocation2 + $0x80] sm:$0xff]  ;;  %v853_v0 = vld [vmem:[#allocation5 + $0xf8] sm:$0xff] }
  0x2b   :  { %1215 = vmatprep.mubr.msk.f32.mxu0 %vm72_vm0, %v64_v14  ;;  %1249 = vmatpush3.msra.mxu0 %v377_v13  ;;  %v852_v1 = vld [vmem:[#allocation5 + $0xf0] sm:$0xff]  ;;  %v851_v2 = vld [vmem:[#allocation5 + $0xe8] sm:$0xff]  ;;  %v850_v3 = vld [vmem:[#allocation5 + $0xe0] sm:$0xff] }
  0x2c   :  { %1232 = vmatmul.mubr.msk.f32.gmra.mxu1 %vm72_vm0, %v61_v8  ;;  %1250 = vmatprep.subr.mxu0 %v376_v15  ;;  %v848_v5 = vld [vmem:[#allocation5 + $0xd0] sm:$0xff]  ;;  %v846_v7 = vld [vmem:[#allocation5 + $0xc0] sm:$0xff]  ;;  %v845_v8 = vld [vmem:[#allocation5 + $0xb8] sm:$0xff] }
  0x2d   :  { %1234 = vmatprep.mubr.msk.f32.mxu1 %vm72_vm0, %v62_v10  ;;  %1251 = vmatpush3.msra.mxu0 %v376_v15  ;;  %v844_v9 = vld [vmem:[#allocation5 + $0xb0] sm:$0xff]  ;;  %v843_v10 = vld [vmem:[#allocation5 + $0xa8] sm:$0xff]  ;;  %v842_v11 = vld [vmem:[#allocation5 + $0xa0] sm:$0xff] }
  0x2e   :  { %1216 = vmatmul.mubr.msk.f32.gmra.mxu0 %vm72_vm0, %v65_v16  ;;  %1252 = vmatprep.subr.mxu0 %v375_v17  ;;  %v840_v13 = vld [vmem:[#allocation5 + $0x90] sm:$0xff]  ;;  %v838_v15 = vld [vmem:[#allocation5 + $0x80] sm:$0xff] }
  0x2f   :  { %1218 = vmatprep.mubr.msk.f32.mxu0 %vm72_vm0, %v66_v18  ;;  %1253 = vmatpush3.msra.mxu0 %v375_v17  ;;  %v836_v17 = vld [vmem:[#allocation5 + $0x70] sm:$0xff] }
  0x30   :  { %1235 = vmatmul.mubr.msk.f32.gmra.mxu1 %vm72_vm0, %v63_v12  ;;  %1254 = vmatprep.subr.mxu0 %v374_v20  ;;  %v841_v12 = vld [vmem:[#allocation5 + $0x98] sm:$0xff] }
  0x31   :  { %1237 = vmatprep.mubr.msk.f32.mxu1 %vm72_vm0, %v64_v14  ;;  %1255 = vmatpush3.msra.mxu0 %v374_v20  ;;  %v839_v14 = vld [vmem:[#allocation5 + $0x88] sm:$0xff]  ;;  %v833_v20 = vld [vmem:[#allocation5 + $0x58] sm:$0xff] }
  0x32   :  { %1219 = vmatmul.mubr.msk.f32.gmra.mxu0 %vm72_vm0, %v67_v19  ;;  %1256 = vmatprep.subr.mxu0 %v373_v21 }
  0x33   :  { %1257 = vmatpush3.msra.mxu0 %v373_v21  ;;  %854 = vmatprep.subr.mxu1 %v853_v0  ;;  %v832_v21 = vld [vmem:[#allocation5 + $0x50] sm:$0xff] }
  0x34   :  { %1238 = vmatmul.mubr.msk.f32.gmra.mxu1 %vm72_vm0, %v65_v16  ;;  %1258 = vmatprep.subr.mxu0 %v372_v22  ;;  %v837_v16 = vld [vmem:[#allocation5 + $0x78] sm:$0xff] }
  0x35   :  { %1240 = vmatprep.mubr.msk.f32.mxu1 %vm72_vm0, %v66_v18  ;;  %1259 = vmatpush3.msra.mxu0 %v372_v22  ;;  %v835_v18 = vld [vmem:[#allocation5 + $0x68] sm:$0xff] }
  0x36   :  { %1260 = vmatprep.subr.mxu0 %v371_v23  ;;  %855 = vmatpush1.msra.mxu1 %v852_v1  ;;  %v831_v22 = vld [vmem:[#allocation5 + $0x48] sm:$0xff] }
  0x37   :  { %1261 = vmatpush3.msra.mxu0 %v371_v23  ;;  %856 = vmatprep.subr.mxu1 %v851_v2  ;;  %v830_v23 = vld [vmem:[#allocation5 + $0x40] sm:$0xff] }
  0x38   :  { %1241 = vmatmul.mubr.msk.f32.gmra.mxu1 %vm72_vm0, %v67_v19  ;;  %1274 = vmatprep.subr.mxu0 %v369_v24  ;;  %v834_v19 = vld [vmem:[#allocation5 + $0x60] sm:$0xff] }
  0x39   :  { %1243 = vmatprep.mubr.msk.f32.mxu1 %vm72_vm0, %v68_v4  ;;  %857 = vmatpush1.msra.mxu1 %v850_v3  ;;  %v849_v4 = vld [vmem:[#allocation5 + $0xd8] sm:$0xff] }
  0x3a   :  { %858 = vmatprep.subr.mxu1 %v849_v4 }
  0x3b   :  { %859 = vmatpush1.msra.mxu1 %v848_v5 }
  0x3c   :  { %1244 = vmatmul.mubr.msk.f32.gmra.mxu1 %vm72_vm0, %v69_v6  ;;  %v847_v6 = vld [vmem:[#allocation5 + $0xc8] sm:$0xff] }
  0x3d   :  { %860 = vmatprep.subr.mxu1 %v847_v6 }
  0x3e   :  { %861 = vmatpush1.msra.mxu1 %v846_v7 }
  0x3f   :  { %862 = vmatprep.subr.mxu1 %v845_v8 }
  0x40   :  { %863 = vmatpush1.msra.mxu1 %v844_v9 }
  0x41   :  { %864 = vmatprep.subr.mxu1 %v843_v10 }
  0x42   :  { %865 = vmatpush1.msra.mxu1 %v842_v11 }
  0x43   :  { %866 = vmatprep.subr.mxu1 %v841_v12 }
  0x44   :  { %867 = vmatpush1.msra.mxu1 %v840_v13 }
  0x45   :  { %868 = vmatprep.subr.mxu1 %v839_v14 }
  0x46   :  { %869 = vmatpush1.msra.mxu1 %v838_v15 }
  0x47   :  { %870 = vmatprep.subr.mxu1 %v837_v16 }
  0x48   :  { %871 = vmatpush1.msra.mxu1 %v836_v17 }
  0x49   :  { %872 = vmatprep.subr.mxu1 %v835_v18 }
  0x4a   :  { %873 = vmatpush1.msra.mxu1 %v834_v19 }
  0x4b   :  { %874 = vmatprep.subr.mxu1 %v833_v20 }
  0x4c   :  { %875 = vmatpush1.msra.mxu1 %v832_v21 }
  0x4d   :  { %876 = vmatprep.subr.mxu1 %v831_v22 }
  0x4e   :  { %877 = vmatpush1.msra.mxu1 %v830_v23 }
  0xe2   :  { %v1208_v25 = vpop.f32.mrf.mxu0 }
  0xe4   :  { %v175_v26 = vpop.f32.mrf.mxu0  ;;  %v1542_v27 = vpop.f32.mrf.mxu1 }
  0xe6   :  { %v1211_v28 = vpop.f32.mrf.mxu0  ;;  %v1544_v29 = vpop.f32.mrf.mxu1 }
  0xe8   :  { %v185_v30 = vpop.f32.mrf.mxu0  ;;  %v1546_v31 = vpop.f32.mrf.mxu1 }
  0xea   :  { %v1214_v32 = vpop.f32.mrf.mxu0  ;;  %v303_v33 = vpop.f32.mrf.mxu1 }
  0xec   :  { %v195_v34 = vpop.f32.mrf.mxu0  ;;  %v1548_v35 = vpop.f32.mrf.mxu1 }
  0xed   :  { %1262 = vmatprep.mubr.msk.f32.mxu0 %vm379_vm1, %v195_v34 }
  0xee   :  { %v1217_v37 = vpop.f32.mrf.mxu0  ;;  %v313_v38 = vpop.f32.mrf.mxu1  ;;  %1263 = vmatmul.mubr.msk.f32.vlgmr.msra.gmra.mxu0 %vm379_vm1, %v1214_v32  ;;  %v1414_v32 = vmov 0.0  }
  0xef   :  { %1275 = vmatpush3.msra.mxu0 %v369_v24  ;;  %v829_v24 = vld [vmem:[#allocation5 + $0x38] sm:$0xff]  ;;  %918 = vmatprep.mubr.f32.mxu1 %v1414_v32 }
  0xf0   :  { %1276 = vmatprep.subr.mxu0 %v368_v36  ;;  %v205_v40 = vpop.f32.mrf.mxu0  ;;  %v1236_v41 = vpop.f32.mrf.mxu1  ;;  %878 = vmatprep.subr.mxu1 %v829_v24 }
  0xf1   :  { %1277 = vmatpush3.msra.mxu0 %v368_v36  ;;  %1265 = vmatprep.mubr.msk.f32.mxu0 %vm379_vm1, %v205_v40 }
  0xf2   :  { %1278 = vmatprep.subr.mxu0 %v367_v39  ;;  %v323_v43 = vpop.f32.mrf.mxu1  ;;  %1266 = vmatmul.mubr.msk.f32.gmra.mxu0 %vm379_vm1, %v1217_v37  ;;  %v1220_v55 = vpop.f32.mrf.mxu0 }
  0xf3   :  { %1279 = vmatpush3.msra.mxu0 %v367_v39  ;;  %1268 = vmatprep.mubr.msk.f32.mxu0 %vm379_vm1, %v323_v43 }
  0xf4   :  { %1280 = vmatprep.subr.mxu0 %v366_v42  ;;  %v1239_v45 = vpop.f32.mrf.mxu1  ;;  %v215_v58 = vpop.f32.mrf.mxu0 }
  0xf5   :  { %1281 = vmatpush3.msra.mxu0 %v366_v42 }
  0xf6   :  { %1282 = vmatprep.subr.mxu0 %v365_v44  ;;  %v333_v47 = vpop.f32.mrf.mxu1  ;;  %1269 = vmatmul.mubr.msk.f32.gmra.mxu0 %vm379_vm1, %v1236_v41 }
  0xf7   :  { %1283 = vmatpush3.msra.mxu0 %v365_v44  ;;  %1271 = vmatprep.mubr.msk.f32.mxu0 %vm379_vm1, %v333_v47 }
  0xf8   :  { %1284 = vmatprep.subr.mxu0 %v364_v46  ;;  %v1242_v59 = vpop.f32.mrf.mxu1 }
  0xf9   :  { %1285 = vmatpush3.msra.mxu0 %v364_v46 }
  0xfa   :  { %1286 = vmatprep.subr.mxu0 %v363_v48  ;;  %1272 = vmatmul.mubr.msk.f32.gmra.mxu0 %vm379_vm1, %v1239_v45  ;;  %v343_v61 = vpop.f32.mrf.mxu1 }
  0xfb   :  { %1287 = vmatpush3.msra.mxu0 %v363_v48  ;;  %1290 = vmatprep.mubr.msk.f32.mxu0 %vm379_vm1, %v175_v26  ;;  %v827_v26 = vld [vmem:[#allocation5 + $0x28] sm:$0xff] }
  0xfc   :  { %1288 = vmatprep.subr.mxu0 %v362_v49  ;;  %v1245_v62 = vpop.f32.mrf.mxu1 }
  0xfd   :  { %1289 = vmatpush3.msra.mxu0 %v362_v49 }
  0xfe   :  { %1302 = vmatprep.subr.mxu0 %v646_v50  ;;  %1291 = vmatmul.mubr.msk.f32.vlgmr.msra.gmra.mxu0 %vm379_vm1, %v1208_v25  ;;  %v353_v63 = vpop.f32.mrf.mxu1  ;;  %v828_v25 = vld [vmem:[#allocation5 + $0x30] sm:$0xff] }
  0xff   :  { %1303 = vmatpush3.msra.mxu0 %v646_v50  ;;  %1293 = vmatprep.mubr.msk.f32.mxu0 %vm379_vm1, %v185_v30  ;;  %v823_v30 = vld [vmem:[#allocation5 + $0x8] sm:$0xff] }
 0x100   :  { %1304 = vmatprep.subr.mxu0 %v645_v51  ;;  %879 = vmatpush1.msra.mxu1 %v828_v25 }
 0x101   :  { %1305 = vmatpush3.msra.mxu0 %v645_v51  ;;  %880 = vmatprep.subr.mxu1 %v827_v26 }
 0x102   :  { %1306 = vmatprep.subr.mxu0 %v644_v52  ;;  %1294 = vmatmul.mubr.msk.f32.gmra.mxu0 %vm379_vm1, %v1211_v28  ;;  %v825_v28 = vld [vmem:[#allocation5 + $0x18] sm:$0xff] }
 0x103   :  { %1307 = vmatpush3.msra.mxu0 %v644_v52  ;;  %1296 = vmatprep.mubr.msk.f32.mxu0 %vm379_vm1, %v303_v33 }
 0x104   :  { %1308 = vmatprep.subr.mxu0 %v643_v53 }
 0x105   :  { %1309 = vmatpush3.msra.mxu0 %v643_v53  ;;  %v1124_v53 = vld [vmem:[%s1647_s3] ss:$0 sm:$0xff] }
 0x106   :  { %1310 = vmatprep.subr.mxu0 %v642_v54  ;;  %1297 = vmatmul.mubr.msk.f32.gmra.mxu0 %vm379_vm1, %v1546_v31  ;;  %v822_v31 = vld [vmem:[#allocation5] sm:$0xff] }
 0x107   :  { %1311 = vmatpush3.msra.mxu0 %v642_v54  ;;  %1299 = vmatprep.mubr.msk.f32.mxu0 %vm379_vm1, %v313_v38 }
 0x108   :  { %1312 = vmatprep.subr.mxu0 %v641_v56 }
 0x109   :  { %1313 = vmatpush3.msra.mxu0 %v641_v56 }
 0x10a   :  { %1314 = vmatprep.subr.mxu0 %v640_v57  ;;  %1300 = vmatmul.mubr.msk.f32.gmra.mxu0 %vm379_vm1, %v1548_v35 }
 0x10b   :  { %1315 = vmatpush3.msra.mxu0 %v640_v57  ;;  %1318 = vmatprep.mubr.msk.f32.mxu0 %vm379_vm1, %v215_v58 }
 0x10c   :  { %1316 = vmatprep.subr.mxu0 %v639_v60 }
 0x10d   :  { %1317 = vmatpush3.msra.mxu0 %v639_v60  ;;  %v1125_v60 = vld [vmem:[%s1648_s4] ss:$0 sm:$0xff] }
 0x10e   :  { %1319 = vmatmul.mubr.msk.f32.vlgmr.msra.gmra.mxu0 %vm379_vm1, %v1220_v55 }
 0x10f   :  { %1321 = vmatprep.mubr.msk.f32.mxu0 %vm379_vm1, %v1544_v29  ;;  %v824_v29 = vld [vmem:[#allocation5 + $0x10] sm:$0xff] }
 0x112   :  { %1322 = vmatmul.mubr.msk.f32.gmra.mxu0 %vm379_vm1, %v1542_v27  ;;  %v826_v27 = vld [vmem:[#allocation5 + $0x20] sm:$0xff] }
 0x113   :  { %1324 = vmatprep.mubr.msk.f32.mxu0 %vm379_vm1, %v343_v61  ;;  %881 = vmatpush1.msra.mxu1 %v826_v27 }
 0x114   :  { %882 = vmatprep.subr.mxu1 %v825_v28 }
 0x115   :  { %883 = vmatpush1.msra.mxu1 %v824_v29 }
 0x116   :  { %1325 = vmatmul.mubr.msk.f32.gmra.mxu0 %vm379_vm1, %v1242_v59  ;;  %884 = vmatprep.subr.mxu1 %v823_v30 }
 0x117   :  { %1327 = vmatprep.mubr.msk.f32.mxu0 %vm379_vm1, %v353_v63  ;;  %885 = vmatpush1.msra.mxu1 %v822_v31 }
 0x11a   :  { %1328 = vmatmul.mubr.msk.f32.gmra.mxu0 %vm379_vm1, %v1245_v62 }
 0x1ae   :  { %v1264_v33 = vpop.f32.mrf.mxu0 }
 0x1b0   :  { %v470_v34 = vpop.f32.mrf.mxu0 }
 0x1b2   :  { %v1267_v35 = vpop.f32.mrf.mxu0 }
 0x1b4   :  { %v480_v36 = vpop.f32.mrf.mxu0 }
 0x1b6   :  { %v1270_v37 = vpop.f32.mrf.mxu0 }
 0x1b8   :  { %v490_v38 = vpop.f32.mrf.mxu0 }
 0x1ba   :  { %v1273_v39 = vpop.f32.mrf.mxu0 }
 0x1bc   :  { %v500_v40 = vpop.f32.mrf.mxu0 }
 0x1be   :  { %v1292_v41 = vpop.f32.mrf.mxu0 }
 0x1bf   :  { %v605_v49 = vadd.f32 %v1292_v41, %v1264_v33  ;;  %v995_v41 = vld [vmem:[%s1651_s7] sm:$0x3] }
 0x1c0   :  { %v599_v42 = vpop.f32.mrf.mxu0 }
 0x1c1   :  { %v600_v51 = vadd.f32 %v599_v42, %v470_v34 }
 0x1c2   :  { %v1295_v43 = vpop.f32.mrf.mxu0 }
 0x1c3   :  { %v615_v62 = vadd.f32 %v1295_v43, %v1267_v35 }
 0x1c4   :  { %v609_v44 = vpop.f32.mrf.mxu0 }
 0x1c5   :  { %v610_v57 = vadd.f32 %v609_v44, %v480_v36  ;;  %v969_v36 = vlaneseq }
 0x1c6   :  { %v1298_v45 = vpop.f32.mrf.mxu0 }
 0x1c7   :  { %v625_v13 = vadd.f32 %v1298_v45, %v1270_v37  ;;  %v970_v37 = vshrl.u32 %v969_v36, 7 }
 0x1c8   :  { %v619_v46 = vpop.f32.mrf.mxu0 }
 0x1c9   :  { %v620_v7 = vadd.f32 %v619_v46, %v490_v38  ;;  %v971_v38 = vsub.s32 0, %v970_v37 }
 0x1ca   :  { %v1301_v47 = vpop.f32.mrf.mxu0 }
 0x1cb   :  { %v635_v24 = vadd.f32 %v1301_v47, %v1273_v39  ;;  %v967_v39 = vld [vmem:[%s1650_s6] sm:$0x3]  ;;  %v1600_v43 = vrot.slane %v995_v41, %v971_v38  ;;  %s1415_s6 = smov [#allocation7]  }
 0x1cc   :  { %v629_v48 = vpop.f32.mrf.mxu0  ;;  %v1598_v42 = vrot.slane %v967_v39, %v971_v38  ;;  %s1061_s7 = sshll.u32 %s1415_s6, 4  ;;  %s1062_s7 = int_to_ptr.vmem [resolvable:$true] %s1061_s7 }
 0x1cd   :  { %v630_v19 = vadd.f32 %v629_v48, %v500_v40  ;;  %v975_v40 = vsub.s32 1, %v970_v37  ;;  %s1382_s9 = scalar_lea.vmem %s1062_s7, 2048  ;;  %p1387_p11 = scmp.lt.s32.totalorder %s1062_s7, %s1062_s7 }
 0x1ce   :  { %v1320_v50 = vpop.f32.mrf.mxu0  ;;  %p1383_p10 = scmp.ne.s32.totalorder %s1062_s7, %s1382_s9  ;;  %p1388_p12 = scmp.lt.s32.totalorder %s1382_s9, %s1382_s9 }
 0x1cf   :  { %v777_v52 = vadd.f32 %v1320_v50, %v605_v49  ;;  %v1602_v44 = vrot.slane %v967_v39, %v975_v40  ;;  %v1605_v46 = vrot.slane %v995_v41, %v975_v40 }
 0x1d0   :  { %v737_v54 = vpop.f32.mrf.mxu0  ;;  %p1389_p13 = por %p1388_p12, %p1387_p11 }
 0x1d1   :  { %v776_v55 = vadd.f32 %v737_v54, %v600_v51  ;;  %v792_v58 = vmul.f32 %v1124_v53, %v777_v52 }
 0x1d2   :  { %v1323_v56 = vpop.f32.mrf.mxu0  ;;  %p1390_p0 = pnand %p1389_p13, %p1383_p10 }
 0x1d3   :  { %v791_v59 = vmul.f32 %v1124_v53, %v776_v55  ;;  %v779_v3 = vadd.f32 %v1323_v56, %v615_v62  ;;  %v807_v5 = vadd.f32 %v1125_v60, %v792_v58 }
 0x1d4   :  { %v747_v61 = vpop.f32.mrf.mxu0 }
 0x1d5   :  { %v806_v63 = vadd.f32 %v1125_v60, %v791_v59  ;;  %v778_v0 = vadd.f32 %v747_v61, %v610_v57  ;;  %v794_v8 = vmul.f32 %v1124_v53, %v779_v3  ;;  %v815_v10 = vmax.f32 %v807_v5, 0.0 }
 0x1d6   :  { %v1326_v1 = vpop.f32.mrf.mxu0 }
 0x1d7   :  { %v814_v2 = vmax.f32 %v806_v63, 0.0  ;;  %v793_v4 = vmul.f32 %v1124_v53, %v778_v0  ;;  %v781_v14 = vadd.f32 %v1326_v1, %v625_v13  ;;  %v809_v17 = vadd.f32 %v1125_v60, %v794_v8 }
 0x1d8   :  { %v757_v6 = vpop.f32.mrf.mxu0 }
 0x1d9   :  { %919 = vmatmul.mubr.f32.vlgmr.msra.gmra.mxu1 %v814_v2  ;;  %v780_v9 = vadd.f32 %v757_v6, %v620_v7  ;;  %v808_v11 = vadd.f32 %v1125_v60, %v793_v4  ;;  %v796_v20 = vmul.f32 %v1124_v53, %v781_v14  ;;  %v817_v22 = vmax.f32 %v809_v17, 0.0 }
 0x1da   :  { %924 = vmatprep.mubr.f32.mxu1 %v1414_v32  ;;  %v1329_v12 = vpop.f32.mrf.mxu0 }
 0x1db   :  { %v795_v15 = vmul.f32 %v1124_v53, %v780_v9  ;;  %v816_v16 = vmax.f32 %v808_v11, 0.0  ;;  %v783_v25 = vadd.f32 %v1329_v12, %v635_v24  ;;  %v811_v28 = vadd.f32 %v1125_v60, %v796_v20 }
 0x1dc   :  { %v767_v18 = vpop.f32.mrf.mxu0 }
 0x1dd   :  { %925 = vmatmul.mubr.f32.gmra.mxu1 %v815_v10  ;;  %v782_v21 = vadd.f32 %v767_v18, %v630_v19  ;;  %v810_v23 = vadd.f32 %v1125_v60, %v795_v15  ;;  %v798_v29 = vmul.f32 %v1124_v53, %v783_v25  ;;  %v819_v30 = vmax.f32 %v811_v28, 0.0 }
 0x1de   :  { %930 = vmatprep.mubr.f32.mxu1 %v1414_v32 }
 0x1df   :  { %v797_v26 = vmul.f32 %v1124_v53, %v782_v21  ;;  %v818_v27 = vmax.f32 %v810_v23, 0.0  ;;  %v813_v34 = vadd.f32 %v1125_v60, %v798_v29 }
 0x1e1   :  { %931 = vmatmul.mubr.f32.gmra.mxu1 %v816_v16  ;;  %v812_v31 = vadd.f32 %v1125_v60, %v797_v26  ;;  %v821_v35 = vmax.f32 %v813_v34, 0.0 }
 0x1e2   :  { %936 = vmatprep.mubr.f32.mxu1 %v1414_v32 }
 0x1e3   :  { %v820_v33 = vmax.f32 %v812_v31, 0.0 }
 0x1e5   :  { %937 = vmatmul.mubr.f32.gmra.mxu1 %v817_v22 }
 0x1e6   :  { %942 = vmatprep.mubr.f32.mxu1 %v1414_v32 }
 0x1e9   :  { %943 = vmatmul.mubr.f32.gmra.mxu1 %v818_v27 }
 0x1ea   :  { %948 = vmatprep.mubr.f32.mxu1 %v1414_v32 }
 0x1ed   :  { %949 = vmatmul.mubr.f32.gmra.mxu1 %v819_v30 }
 0x1ee   :  { %954 = vmatprep.mubr.f32.mxu1 %v1414_v32 }
 0x1f1   :  { %955 = vmatmul.mubr.f32.gmra.mxu1 %v820_v33 }
 0x1f2   :  { %960 = vmatprep.mubr.f32.mxu1 %v1414_v32 }
 0x1f5   :  { %961 = vmatmul.mubr.f32.gmra.mxu1 %v821_v35 }
 0x299   :  { %v920_v32 = vpop.f32.mrf.mxu1 }
 0x29a   :  { %v979_v45 = vmul.f32 %v1598_v42, %v920_v32 }
 0x29b   :  { %v922_v47 = vpop.f32.mrf.mxu1 }
 0x29c   :  { %v1007_v48 = vadd.f32 %v1600_v43, %v979_v45  ;;  %v980_v49 = vmul.f32 %v1602_v44, %v922_v47 }
 0x29d   :  { %v926_v50 = vpop.f32.mrf.mxu1 }
 0x29e   :  { %v1023_v51 = vmax.f32 %v1007_v48, 0.0  ;;  %v1008_v52 = vadd.f32 %v1605_v46, %v980_v49  ;;  %v981_v53 = vmul.f32 %v1598_v42, %v926_v50 }
 0x29f   :  { %v928_v54 = vpop.f32.mrf.mxu1 }
 0x2a0   :  { %1039 = vst [vmem:[#allocation7] sm:$0xff] %v1023_v51  ;;  %v1024_v55 = vmax.f32 %v1008_v52, 0.0  ;;  %v1009_v56 = vadd.f32 %v1600_v43, %v981_v53  ;;  %v982_v57 = vmul.f32 %v1602_v44, %v928_v54 }
 0x2a1   :  { %v932_v58 = vpop.f32.mrf.mxu1 }
 0x2a2   :  { %1040 = vst [vmem:[#allocation7 + $0x8] sm:$0xff] %v1024_v55  ;;  %v1025_v59 = vmax.f32 %v1009_v56, 0.0  ;;  %v1010_v60 = vadd.f32 %v1605_v46, %v982_v57  ;;  %v983_v61 = vmul.f32 %v1598_v42, %v932_v58 }
 0x2a3   :  { %v934_v62 = vpop.f32.mrf.mxu1 }
 0x2a4   :  { %1041 = vst [vmem:[#allocation7 + $0x10] sm:$0xff] %v1025_v59  ;;  %v1026_v63 = vmax.f32 %v1010_v60, 0.0  ;;  %v1011_v0 = vadd.f32 %v1600_v43, %v983_v61  ;;  %v984_v1 = vmul.f32 %v1602_v44, %v934_v62 }
 0x2a5   :  { %v938_v2 = vpop.f32.mrf.mxu1 }
 0x2a6   :  { %1042 = vst [vmem:[#allocation7 + $0x18] sm:$0xff] %v1026_v63  ;;  %v1027_v3 = vmax.f32 %v1011_v0, 0.0  ;;  %v1012_v4 = vadd.f32 %v1605_v46, %v984_v1  ;;  %v985_v5 = vmul.f32 %v1598_v42, %v938_v2 }
 0x2a7   :  { %v940_v6 = vpop.f32.mrf.mxu1 }
 0x2a8   :  { %1043 = vst [vmem:[#allocation7 + $0x20] sm:$0xff] %v1027_v3  ;;  %v1028_v7 = vmax.f32 %v1012_v4, 0.0  ;;  %v1013_v8 = vadd.f32 %v1600_v43, %v985_v5  ;;  %v986_v9 = vmul.f32 %v1602_v44, %v940_v6 }
 0x2a9   :  { %v944_v10 = vpop.f32.mrf.mxu1 }
 0x2aa   :  { %1044 = vst [vmem:[#allocation7 + $0x28] sm:$0xff] %v1028_v7  ;;  %v1029_v11 = vmax.f32 %v1013_v8, 0.0  ;;  %v1014_v12 = vadd.f32 %v1605_v46, %v986_v9  ;;  %v987_v13 = vmul.f32 %v1598_v42, %v944_v10 }
 0x2ab   :  { %v946_v14 = vpop.f32.mrf.mxu1 }
 0x2ac   :  { %1045 = vst [vmem:[#allocation7 + $0x30] sm:$0xff] %v1029_v11  ;;  %v1030_v15 = vmax.f32 %v1014_v12, 0.0  ;;  %v1015_v16 = vadd.f32 %v1600_v43, %v987_v13  ;;  %v988_v17 = vmul.f32 %v1602_v44, %v946_v14 }
 0x2ad   :  { %v950_v18 = vpop.f32.mrf.mxu1 }
 0x2ae   :  { %1046 = vst [vmem:[#allocation7 + $0x38] sm:$0xff] %v1030_v15  ;;  %v1031_v19 = vmax.f32 %v1015_v16, 0.0  ;;  %v1016_v20 = vadd.f32 %v1605_v46, %v988_v17  ;;  %v989_v21 = vmul.f32 %v1598_v42, %v950_v18 }
 0x2af   :  { %v952_v22 = vpop.f32.mrf.mxu1 }
 0x2b0   :  { %1048 = vst [vmem:[#allocation7 + $0x40] sm:$0xff] %v1031_v19  ;;  %v1032_v23 = vmax.f32 %v1016_v20, 0.0  ;;  %v1017_v24 = vadd.f32 %v1600_v43, %v989_v21  ;;  %v990_v25 = vmul.f32 %v1602_v44, %v952_v22 }
 0x2b1   :  { %v956_v26 = vpop.f32.mrf.mxu1 }
 0x2b2   :  { %1049 = vst [vmem:[#allocation7 + $0x48] sm:$0xff] %v1032_v23  ;;  %v1033_v27 = vmax.f32 %v1017_v24, 0.0  ;;  %v1018_v28 = vadd.f32 %v1605_v46, %v990_v25  ;;  %v991_v29 = vmul.f32 %v1598_v42, %v956_v26 }
 0x2b3   :  { %v958_v30 = vpop.f32.mrf.mxu1 }
 0x2b4   :  { %1050 = vst [vmem:[#allocation7 + $0x50] sm:$0xff] %v1033_v27  ;;  %v1034_v31 = vmax.f32 %v1018_v28, 0.0  ;;  %v1019_v33 = vadd.f32 %v1600_v43, %v991_v29  ;;  %v992_v34 = vmul.f32 %v1602_v44, %v958_v30 }
 0x2b5   :  { %v962_v35 = vpop.f32.mrf.mxu1 }
 0x2b6   :  { %1051 = vst [vmem:[#allocation7 + $0x58] sm:$0xff] %v1034_v31  ;;  %v1035_v36 = vmax.f32 %v1019_v33, 0.0  ;;  %v1020_v37 = vadd.f32 %v1605_v46, %v992_v34  ;;  %v993_v38 = vmul.f32 %v1598_v42, %v962_v35 }
 0x2b7   :  { %v964_v39 = vpop.f32.mrf.mxu1 }
 0x2b8   :  { %1052 = vst [vmem:[#allocation7 + $0x60] sm:$0xff] %v1035_v36  ;;  %v1036_v40 = vmax.f32 %v1020_v37, 0.0  ;;  %v1021_v41 = vadd.f32 %v1600_v43, %v993_v38  ;;  %v994_v32 = vmul.f32 %v1602_v44, %v964_v39 }
 0x2ba   :  { %1053 = vst [vmem:[#allocation7 + $0x68] sm:$0xff] %v1036_v40  ;;  %v1037_v45 = vmax.f32 %v1021_v41, 0.0  ;;  %v1022_v47 = vadd.f32 %v1605_v46, %v994_v32 }
 0x2bc   :  { %1054 = vst [vmem:[#allocation7 + $0x70] sm:$0xff] %v1037_v45  ;;  %v1038_v48 = vmax.f32 %v1022_v47, 0.0 }
 0x2be   :  { %1055 = vst [vmem:[#allocation7 + $0x78] sm:$0xff] %v1038_v48 }
 0x2bf   :  { %1393 = shalt.err (!%p1390_p0)
}
 0x2c0   :  { %1067 = dma.vmem_to_hbm [thread:$0]  %s1062_s7, 2048, %s1652_s8, [#allocation4], %s1412_s15, %s1412_s15, %s1413_s16  }
 0x2c1   :  { %1406 = dma.done.wait [#allocation4], 2048  }
 0x2c2   :  { %1407 = vsyncadd [#allocation4], 4294965248 }
 0x2c3   :  { %1071 = vsyncpa [#allocation3], 1 }
 0x2c4   :  { %1072 = vsyncpa [#allocation6], 1 }
 0x2c5   :  { %1073 = vsyncpa [#allocation4], 1 }

</bundles_post_ra>
